<compile_context>
chip_gen: v7x
topology: tpu7x:2x2x1
jax: 0.10.0
libtpu: 0.0.40
codegen_flags: <defaults>
</compile_context>

<pallas_src>
import functools

import jax
import jax.numpy as jnp
from jax import lax
from jax.experimental import pallas as pl
from jax.experimental.pallas import tpu as pltpu


def mlp_kernel(x_ref,
               w1_ref, b1_ref,
               w2_ref, b2_ref,
               w3_ref, b3_ref,
               w4_ref, b4_ref,
               o_ref):
    # x_ref: (TB, in_dim) -- native batch-major tile streamed straight from HBM.
    x = x_ref[...]

    # Layer 1: contract the feature axis of both operands:
    #   (15, 21) x (TB, 21) -> (15, TB).  Feature-major from here on, so the
    #   batch sits on the lane axis for every intermediate and the output.
    h = lax.dot_general(w1_ref[...], x,
                        dimension_numbers=(((1,), (1,)), ((), ())),
                        preferred_element_type=jnp.float32) + b1_ref[...]
    h = jnp.maximum(h, 0.0)

    # Layer 2: (10,15) @ (15,TB) -> (10,TB)
    h = jnp.dot(w2_ref[...], h, preferred_element_type=jnp.float32) + b2_ref[...]
    h = jnp.maximum(h, 0.0)

    # Layer 3: (5,10) @ (10,TB) -> (5,TB)
    h = jnp.dot(w3_ref[...], h, preferred_element_type=jnp.float32) + b3_ref[...]
    h = jnp.maximum(h, 0.0)

    # Output layer: (1,5) @ (5,TB) -> (1,TB), lane-dense store, no activation.
    y = jnp.dot(w4_ref[...], h, preferred_element_type=jnp.float32) + b4_ref[...]
    o_ref[...] = y.astype(o_ref.dtype)


@functools.partial(jax.jit, static_argnames=("tb",))
def mlp_forward(x, params, *, tb=16384):
    """x: (batch, 21) f32. params: PyTorch-style w_i (out,in), b_i (out,)."""
    batch, in_dim = x.shape
    out_dim = params["w4"].shape[0]

    # Lane-aligned batch tile, as large as `tb`, but small enough that the
    # grid has >= 2 steps when the batch allows it (lets megacore split tiles
    # across the two TensorCores on v7x).  No explicit padding of the batch.
    half = pl.cdiv(pl.cdiv(batch, 2), 128) * 128
    tb_eff = max(128, min(tb, half))
    grid = (pl.cdiv(batch, tb_eff),)

    args = (x,
            params["w1"], params["b1"][:, None],
            params["w2"], params["b2"][:, None],
            params["w3"], params["b3"][:, None],
            params["w4"], params["b4"][:, None])

    # x is tiled over the batch; weights/biases are fully resident in VMEM
    # (constant index maps) across all grid steps.
    resident = lambda a: pl.BlockSpec(a.shape, lambda i: (0, 0))
    in_specs = [pl.BlockSpec((tb_eff, in_dim), lambda i: (i, 0))] + \
               [resident(a) for a in args[1:]]
    out_spec = pl.BlockSpec((out_dim, tb_eff), lambda i: (0, i))

    # VMEM budget (bytes), accounting for layout padding:
    #   * x tile pads its 21-wide feature axis to 128 lanes, double buffered
    #   * (1, TB) output pads to 8 sublanes, double buffered
    #   * (15/10/5/1, TB) intermediates pad to 16/16/8/8 sublanes (x2 for temps)
    #   * the 8 resident param arrays each pad to small (8,128) tiles
    x_tile_bytes = tb_eff * 128 * 4
    out_tile_bytes = 8 * tb_eff * 4
    inter_bytes = (16 + 16 + 8 + 8) * tb_eff * 4
    vmem_bytes = int(2 * (x_tile_bytes + out_tile_bytes)
                     + 2 * inter_bytes
                     + (64 << 10)       # resident params
                     + (4 << 20))       # compiler scratch headroom
    vmem_bytes = max(vmem_bytes, 16 << 20)

    y_t = pl.pallas_call(
        mlp_kernel,
        out_shape=jax.ShapeDtypeStruct((out_dim, batch), jnp.float32),
        grid=grid,
        in_specs=in_specs,
        out_specs=out_spec,
        compiler_params=pltpu.CompilerParams(
            dimension_semantics=("parallel",),
            vmem_limit_bytes=vmem_bytes,
        ),
    )(*args)

    # (out_dim, batch) -> (batch, out_dim); for out_dim=1 this is a free reshape.
    return y_t.T


def init_params(key, input_dim=21, h1=15, h2=10, h3=5, output=1):
    """PyTorch nn.Linear-style params: W (out,in), b (out,), U(-1/sqrt(fan_in), +)."""
    dims = [(input_dim, h1), (h1, h2), (h2, h3), (h3, output)]
    params = {}
    for i, (fan_in, fan_out) in enumerate(dims, start=1):
        key, kw, kb = jax.random.split(key, 3)
        bound = 1.0 / (fan_in ** 0.5)
        params[f"w{i}"] = jax.random.uniform(
            kw, (fan_out, fan_in), dtype=jnp.float32, minval=-bound, maxval=bound)
        params[f"b{i}"] = jax.random.uniform(
            kb, (fan_out,), dtype=jnp.float32, minval=-bound, maxval=bound)
    return params


def reference_forward(x, params):
    """Pure-JAX reference (matches the PyTorch forward)."""
    h = jnp.maximum(x @ params["w1"].T + params["b1"], 0.0)
    h = jnp.maximum(h @ params["w2"].T + params["b2"], 0.0)
    h = jnp.maximum(h @ params["w3"].T + params["b3"], 0.0)
    return h @ params["w4"].T + params["b4"]


if __name__ == "__main__":
    key = jax.random.PRNGKey(0)
    kx1, kx2, kp = jax.random.split(key, 3)

    input_dim = 21
    params = init_params(kp, input_dim=input_dim)

    # Case 1: batch=200 -> tb_eff=128, grid=2 with a ragged last block.
    x1 = jax.random.normal(kx1, (200, input_dim), dtype=jnp.float32)
    out1 = jax.block_until_ready(mlp_forward(x1, params))
    ref1 = reference_forward(x1, params)
    assert out1.shape == (200, 1), out1.shape
    assert jnp.allclose(out1, ref1, atol=1e-5, rtol=1e-5), "mismatch vs reference (case 1)"

    # Case 2: batch=777 with tb=256 -> grid=4, exercises multi-tile + ragged tail.
    x2 = jax.random.normal(kx2, (777, input_dim), dtype=jnp.float32)
    out2 = jax.block_until_ready(mlp_forward(x2, params, tb=256))
    ref2 = reference_forward(x2, params)
    assert out2.shape == (777, 1), out2.shape
    assert jnp.allclose(out2, ref2, atol=1e-5, rtol=1e-5), "mismatch vs reference (case 2)"

    print("KERNEL_OK")
</pallas_src>

<mosaic_0001>
module attributes {stable_mosaic.version = 11 : i64} {
  func.func @mlp_kernel(%arg0: i32, %arg1: memref<128x21xf32, #tpu.memory_space<vmem>>, %arg2: memref<15x21xf32, #tpu.memory_space<vmem>>, %arg3: memref<15x1xf32, #tpu.memory_space<vmem>>, %arg4: memref<10x15xf32, #tpu.memory_space<vmem>>, %arg5: memref<10x1xf32, #tpu.memory_space<vmem>>, %arg6: memref<5x10xf32, #tpu.memory_space<vmem>>, %arg7: memref<5x1xf32, #tpu.memory_space<vmem>>, %arg8: memref<1x5xf32, #tpu.memory_space<vmem>>, %arg9: memref<1x1xf32, #tpu.memory_space<vmem>>, %arg10: memref<1x128xf32, #tpu.memory_space<vmem>>) attributes {dimension_semantics = [#tpu.dimension_semantics<parallel>], iteration_bounds = array<i64: 2>, scalar_prefetch = 0 : i64, scratch_operands = 0 : i64, tpu.core_type = #tpu.core_type<tc>, window_params = [{transform_indices = @transform_0, window_bounds = array<i64: 128, 21>}, {pipeline_mode = #tpu.pipeline_mode<synchronous>, transform_indices = @transform_1, window_bounds = array<i64: 15, 21>}, {pipeline_mode = #tpu.pipeline_mode<synchronous>, transform_indices = @transform_2, window_bounds = array<i64: 15, 1>}, {pipeline_mode = #tpu.pipeline_mode<synchronous>, transform_indices = @transform_3, window_bounds = array<i64: 10, 15>}, {pipeline_mode = #tpu.pipeline_mode<synchronous>, transform_indices = @transform_4, window_bounds = array<i64: 10, 1>}, {pipeline_mode = #tpu.pipeline_mode<synchronous>, transform_indices = @transform_5, window_bounds = array<i64: 5, 10>}, {pipeline_mode = #tpu.pipeline_mode<synchronous>, transform_indices = @transform_6, window_bounds = array<i64: 5, 1>}, {pipeline_mode = #tpu.pipeline_mode<synchronous>, transform_indices = @transform_7, window_bounds = array<i64: 1, 5>}, {pipeline_mode = #tpu.pipeline_mode<synchronous>, transform_indices = @transform_8, window_bounds = array<i64: 1, 1>}, {transform_indices = @transform_9, window_bounds = array<i64: 1, 128>}]} {
    %c0 = arith.constant 0 : index
    %c0_0 = arith.constant 0 : index
    %0 = vector.load %arg1[%c0, %c0_0] : memref<128x21xf32, #tpu.memory_space<vmem>>, vector<128x21xf32>
    %c0_1 = arith.constant 0 : index
    %c0_2 = arith.constant 0 : index
    %1 = vector.load %arg2[%c0_1, %c0_2] : memref<15x21xf32, #tpu.memory_space<vmem>>, vector<15x21xf32>
    %cst = arith.constant dense<0.000000e+00> : vector<15x128xf32>
    %2 = tpu.matmul %1, %0, %cst {dimension_numbers = #tpu.dot_dimension_numbers<[1], [1], [0], [0], [0, 0, 1, 0], [], []>} : vector<15x21xf32>, vector<128x21xf32>, vector<15x128xf32> -> vector<15x128xf32>
    %c0_3 = arith.constant 0 : index
    %c0_4 = arith.constant 0 : index
    %3 = vector.load %arg3[%c0_3, %c0_4] : memref<15x1xf32, #tpu.memory_space<vmem>>, vector<15x1xf32>
    %4 = vector.broadcast %3 : vector<15x1xf32> to vector<15x128xf32>
    %5 = arith.addf %2, %4 : vector<15x128xf32>
    %cst_5 = arith.constant 0.000000e+00 : f32
    %6 = vector.broadcast %cst_5 : f32 to vector<15x128xf32>
    %7 = arith.maximumf %5, %6 : vector<15x128xf32>
    %c0_6 = arith.constant 0 : index
    %c0_7 = arith.constant 0 : index
    %8 = vector.load %arg4[%c0_6, %c0_7] : memref<10x15xf32, #tpu.memory_space<vmem>>, vector<10x15xf32>
    %cst_8 = arith.constant dense<0.000000e+00> : vector<10x128xf32>
    %9 = tpu.matmul %8, %7, %cst_8 {dimension_numbers = #tpu.dot_dimension_numbers<[1], [0], [0], [1], [0, 0, 1, 1], [], []>} : vector<10x15xf32>, vector<15x128xf32>, vector<10x128xf32> -> vector<10x128xf32>
    %c0_9 = arith.constant 0 : index
    %c0_10 = arith.constant 0 : index
    %10 = vector.load %arg5[%c0_9, %c0_10] : memref<10x1xf32, #tpu.memory_space<vmem>>, vector<10x1xf32>
    %11 = vector.broadcast %10 : vector<10x1xf32> to vector<10x128xf32>
    %12 = arith.addf %9, %11 : vector<10x128xf32>
    %cst_11 = arith.constant 0.000000e+00 : f32
    %13 = vector.broadcast %cst_11 : f32 to vector<10x128xf32>
    %14 = arith.maximumf %12, %13 : vector<10x128xf32>
    %c0_12 = arith.constant 0 : index
    %c0_13 = arith.constant 0 : index
    %15 = vector.load %arg6[%c0_12, %c0_13] : memref<5x10xf32, #tpu.memory_space<vmem>>, vector<5x10xf32>
    %cst_14 = arith.constant dense<0.000000e+00> : vector<5x128xf32>
    %16 = tpu.matmul %15, %14, %cst_14 {dimension_numbers = #tpu.dot_dimension_numbers<[1], [0], [0], [1], [0, 0, 1, 1], [], []>} : vector<5x10xf32>, vector<10x128xf32>, vector<5x128xf32> -> vector<5x128xf32>
    %c0_15 = arith.constant 0 : index
    %c0_16 = arith.constant 0 : index
    %17 = vector.load %arg7[%c0_15, %c0_16] : memref<5x1xf32, #tpu.memory_space<vmem>>, vector<5x1xf32>
    %18 = vector.broadcast %17 : vector<5x1xf32> to vector<5x128xf32>
    %19 = arith.addf %16, %18 : vector<5x128xf32>
    %cst_17 = arith.constant 0.000000e+00 : f32
    %20 = vector.broadcast %cst_17 : f32 to vector<5x128xf32>
    %21 = arith.maximumf %19, %20 : vector<5x128xf32>
    %c0_18 = arith.constant 0 : index
    %c0_19 = arith.constant 0 : index
    %22 = vector.load %arg8[%c0_18, %c0_19] : memref<1x5xf32, #tpu.memory_space<vmem>>, vector<1x5xf32>
    %cst_20 = arith.constant dense<0.000000e+00> : vector<1x128xf32>
    %23 = tpu.matmul %22, %21, %cst_20 {dimension_numbers = #tpu.dot_dimension_numbers<[1], [0], [0], [1], [0, 0, 1, 1], [], []>} : vector<1x5xf32>, vector<5x128xf32>, vector<1x128xf32> -> vector<1x128xf32>
    %c0_21 = arith.constant 0 : index
    %c0_22 = arith.constant 0 : index
    %24 = vector.load %arg9[%c0_21, %c0_22] : memref<1x1xf32, #tpu.memory_space<vmem>>, vector<1x1xf32>
    %25 = vector.broadcast %24 : vector<1x1xf32> to vector<1x128xf32>
    %26 = arith.addf %23, %25 : vector<1x128xf32>
    %c0_23 = arith.constant 0 : index
    %c0_24 = arith.constant 0 : index
    %27 = vector.load %arg10[%c0_23, %c0_24] : memref<1x128xf32, #tpu.memory_space<vmem>>, vector<1x128xf32>
    tpu.vector_store %arg10[%c0_23, %c0_24], %26 {strides = array<i32>} : memref<1x128xf32, #tpu.memory_space<vmem>>, vector<1x128xf32>,
    return
  }
  func.func @transform_0(%arg0: i32) -> (i32, i32) {
    %c0_i32 = arith.constant 0 : i32
    %c0_i32_0 = arith.constant 0 : i32
    return %arg0, %c0_i32 : i32, i32
  }
  func.func @transform_1(%arg0: i32) -> (i32, i32) {
    %c0_i32 = arith.constant 0 : i32
    %c0_i32_0 = arith.constant 0 : i32
    %c0_i32_1 = arith.constant 0 : i32
    return %c0_i32, %c0_i32_0 : i32, i32
  }
  func.func @transform_2(%arg0: i32) -> (i32, i32) {
    %c0_i32 = arith.constant 0 : i32
    %c0_i32_0 = arith.constant 0 : i32
    %c0_i32_1 = arith.constant 0 : i32
    return %c0_i32, %c0_i32_0 : i32, i32
  }
  func.func @transform_3(%arg0: i32) -> (i32, i32) {
    %c0_i32 = arith.constant 0 : i32
    %c0_i32_0 = arith.constant 0 : i32
    %c0_i32_1 = arith.constant 0 : i32
    return %c0_i32, %c0_i32_0 : i32, i32
  }
  func.func @transform_4(%arg0: i32) -> (i32, i32) {
    %c0_i32 = arith.constant 0 : i32
    %c0_i32_0 = arith.constant 0 : i32
    %c0_i32_1 = arith.constant 0 : i32
    return %c0_i32, %c0_i32_0 : i32, i32
  }
  func.func @transform_5(%arg0: i32) -> (i32, i32) {
    %c0_i32 = arith.constant 0 : i32
    %c0_i32_0 = arith.constant 0 : i32
    %c0_i32_1 = arith.constant 0 : i32
    return %c0_i32, %c0_i32_0 : i32, i32
  }
  func.func @transform_6(%arg0: i32) -> (i32, i32) {
    %c0_i32 = arith.constant 0 : i32
    %c0_i32_0 = arith.constant 0 : i32
    %c0_i32_1 = arith.constant 0 : i32
    return %c0_i32, %c0_i32_0 : i32, i32
  }
  func.func @transform_7(%arg0: i32) -> (i32, i32) {
    %c0_i32 = arith.constant 0 : i32
    %c0_i32_0 = arith.constant 0 : i32
    %c0_i32_1 = arith.constant 0 : i32
    return %c0_i32, %c0_i32_0 : i32, i32
  }
  func.func @transform_8(%arg0: i32) -> (i32, i32) {
    %c0_i32 = arith.constant 0 : i32
    %c0_i32_0 = arith.constant 0 : i32
    %c0_i32_1 = arith.constant 0 : i32
    return %c0_i32, %c0_i32_0 : i32, i32
  }
  func.func @transform_9(%arg0: i32) -> (i32, i32) {
    %c0_i32 = arith.constant 0 : i32
    %c0_i32_0 = arith.constant 0 : i32
    return %c0_i32, %arg0 : i32, i32
  }
}

</mosaic_0001>

<bundles_post_ra>
// kernel: mlp_forward.1
= control target key start
LH: loop header
LB: loop body
LE: loop exit
PB: predicated region body
PF: predicated region fallthrough
CT: control target
= control target key end

     0   :  { %s1400_s0 = inlined_call_operand.vmem [shape: f32[200,21], index: 0, kind: input, shape index: {}]   ;;  %s1401_s1 = inlined_call_operand.vmem [shape: f32[15,21], index: 1, kind: input, shape index: {}]   ;;  %s1402_s2 = inlined_call_operand.vmem [shape: f32[15,1], index: 2, kind: input, shape index: {}]   ;;  %s1403_s3 = inlined_call_operand.vmem [shape: f32[10,15], index: 3, kind: input, shape index: {}]   ;;  %s1404_s4 = inlined_call_operand.vmem [shape: f32[10,1], index: 4, kind: input, shape index: {}]   ;;  %s1405_s5 = inlined_call_operand.vmem [shape: f32[5,10], index: 5, kind: input, shape index: {}]   ;;  %s1406_s6 = inlined_call_operand.vmem [shape: f32[5,1], index: 6, kind: input, shape index: {}]   ;;  %s1407_s7 = inlined_call_operand.vmem [shape: f32[1,5], index: 7, kind: input, shape index: {}]   ;;  %s1408_s8 = inlined_call_operand.<no memory space> [shape: f32[1,1], index: 8, kind: input, shape index: {}]   ;;  %s1409_s9 = inlined_call_operand.hbm [shape: f32[1,200], index: 9, kind: output, shape index: {}]  }
   0x1   :  { %v14_v0 = vstv %s1408_s8 }
   0x2   :  { %15 = vst [vmem:[#allocation2] sm:$0x1] %v14_v0 }
   0x3   :  { %16 = vsyncpa [#allocation4], 0 }
   0x4   :  { %18 = vsyncpa [#allocation4 + $0x1], 0  ;;  %s1204_s11 = smov 0   ;;  %s1206_s12 = smov 0  }
   0x5   :  { %s1208_s13 = smov 0   ;;  %s1210_s14 = smov 0  }
   0x6 LB: > { %s861_s8 = sadd.s32 4294967295, %s1143_s14   ;;  %s862_s15 = sadd.s32 4294967294, %s1143_s14   ;;  %s1143_s14 = sphi %s1210_s14, %s1417_s14   ;;  %s1139_s13 = sphi %s1208_s13, %s1416_s13   ;;  %s1135_s12 = sphi %s1206_s12, %s1415_s12   ;;  %s1131_s11 = sphi %s1204_s11, %s1414_s11  }
   0x7   : > { %s1227_s16 = sadd.s32 1, %s1143_s14   ;;  %s225_s17 = sadd.s32 1, %s1139_s13 }
   0x8   : > { %s222_s18 = ssub.s32 %s1143_s14, %s1227_s16  ;;  %p235_p0 = scmp.ne.s32.totalorder %s1139_s13, %s1135_s12 }
   0x9   : > { %p223_p1 = scmp.eq.s32.totalorder %s222_s18, 0  ;;  %p236_p2 = scmp.eq.s32.totalorder %s861_s8, 1 }
   0xa   : > { %p241_p3 = scmp.ne.s32.totalorder %s1135_s12, %s1131_s11  ;;  %p242_p4 = scmp.eq.s32.totalorder %s862_s15, 1 }
   0xb   : > { %s1237_s19 = scalar_select %p223_p1, %s1139_s13, %s225_s17  }
   0xc   : > { %p1239_p5 = por %p236_p2, %p235_p0  ;;  %p1243_p6 = por %p242_p4, %p241_p3 }
   0xd   : > { %p865_p7 = scmp.ge.s32.totalorder %s1143_s14, 1  ;;  %p301_p8 = scmp.lt.s32.totalorder %s1143_s14, 3 }
   0xf   : > { %p302_p9 = pnand %p865_p7, %p301_p8 }
  0x10   : > { %s1249_s22 = sshll.u32 (!%p302_p9), %s861_s8, 4  ;;  %vm384_vm0 = vcmask (!%p302_p9), 171008   ;;  %v370_v1 = vld [vmem:[%s1401_s1] sm:$0xff] (!%p302_p9)  ;;  %v1145_v2 = vmov (!%p302_p9), 0   ;;  %v373_v4 = vld [vmem:[%s1402_s2 + $0x8] sm:$0x7f] (!%p302_p9)  ;;  %v711_v0 = vlaneseq (!%p302_p9) }
  0x11   : > { %305 = sbr.rel (%p302_p9) target bundleno = 985 (0x3d9), region = 56  ;;  %p345_p10 = scmp.lt.s32.totalorder (!%p302_p9), %s1249_s22, 24  ;;  %955 = vmatprep.mubr.msk.f32.mxu0 (!%p302_p9), %vm384_vm0, %v370_v1  ;;  %1079 = vset.pattern.permute.xlu0 (!%p302_p9), %v1145_v2  ;;  %v372_v3 = vld [vmem:[%s1402_s2] sm:$0xff] (!%p302_p9)  ;;  %vm1270_vm1 = vmpackc.low (!%p302_p9), %vm384_vm0, %vm384_vm0  ;;  %v371_v31 = vld [vmem:[%s1401_s1 + $0x8] sm:$0x7f] (!%p302_p9)  ;;  %vm530_vm2 = vcmask (!%p302_p9), 121856  }
  0x12   : > { %376 = vperm.xlu0 (!%p302_p9), %1079, %v372_v3   ;;  %1080 = vset.pattern.permute.xlu1 (!%p302_p9), %v1145_v2  ;;  %v619_v6 = vld [vmem:[%s1406_s6] sm:$0x1f] (!%p302_p9)  ;;  %v519_v34 = vld [vmem:[%s1404_s4 + $0x8] sm:$0x3] (!%p302_p9)  ;;  %vm537_vm3 = vcmask (!%p302_p9), 1046528   ;;  %vm1146_vm4 = vmmov (!%p302_p9), 1   ;;  %s1358_s29 = scalar_lea.hbm (!%p302_p9), %s1409_s9, %s1249_s22 }
  0x13   : > { %v516_v32 = vld [vmem:[%s1403_s3] sm:$0xff] (!%p302_p9)  ;;  %vm1026_vm5 = vmpackc.low (!%p302_p9), %vm537_vm3, %vm1146_vm4  ;;  %v517_v45 = vld [vmem:[%s1403_s3 + $0x8] sm:$0x3] (!%p302_p9)  ;;  %v1147_v46 = vmov (!%p302_p9), 0.0|0.0   ;;  %vm1148_vm6 = vmmov (!%p302_p9), 0   ;;  %v1149_v47 = vmov (!%p302_p9), 0.0  }
  0x14   : > { %962 = vmatprep.mubr.msk.f32.mxu1 (!%p302_p9), %vm530_vm2, %v516_v32  ;;  %v518_v33 = vld [vmem:[%s1404_s4] sm:$0xff] (!%p302_p9)  ;;  %vm629_vm7 = vcmask (!%p302_p9), 1041408   ;;  %vm625_vm9 = vcmask (!%p302_p9), 80896   ;;  %vm719_vm10 = vcmask (!%p302_p9), 1044480   ;;  %vm715_vm11 = vcmask (!%p302_p9), 39936   ;;  %s338_s24 = sand.u32 (!%p302_p9), 1, %s1135_s12  }
  0x15   : > { %522 = vperm.xlu1 (!%p302_p9), %1080, %v518_v33   ;;  %v705_v35 = vld [vmem:[#allocation2] sm:$0x1] (!%p302_p9)  ;;  %vm1033_vm8 = vmpackc.low (!%p302_p9), %vm629_vm7, %vm1146_vm4  ;;  %v712_v1 = vshrl.u32 (!%p302_p9), %v711_v0, 7  ;;  %s339_s25 = scalar_lea.vmem (!%p302_p9), [#allocation3], %s338_s24  ;;  %s1150_s8 = smov (!%p302_p9), [#allocation3]  }
  0x16   : > { %381 = vperm.xlu0 (!%p302_p9), %1079, %v373_v4   ;;  %v618_v57 = vld [vmem:[%s1405_s5] sm:$0x1f] (!%p302_p9)  ;;  %s807_s26 = sshll.u32 (!%p302_p9), %s339_s25, 4  ;;  %s1360_s26 = int_to_ptr.vmem [resolvable:$true] %s807_s26 }
  0x17   : > { %v704_v63 = vld [vmem:[%s1407_s7] sm:$0x1] (!%p302_p9)  ;;  %v713_v2 = vsub.s32 (!%p302_p9), 0, %v712_v1  ;;  %s1081_s10 = scalar_lea.vmem (!%p302_p9), %s1360_s26, 16 }
  0x18   : > { %s346_s27 = scalar_select %p345_p10, %s1249_s22, 24 }
  0x19   : > { %527 = vperm.xlu1 %1080, %v519_v34   ;;  %p1082_p11 = scmp.ne.s32.totalorder %s1360_s26, %s1081_s10 }
  0x1a   : > { %s867_s30 = sshll.u32 %s346_s27, 3  ;;  %622 = vperm.xlu0 %1079, %v619_v6  }
  0x1b   : > { %s1266_s15 = scalar_lea.vmem %s1400_s0, %s867_s30  ;;  %s795_s30 = scalar_lea.sflag [#allocation4], %s338_s24 }
  0x1c   : > { %v354_v7 = vld [vmem:[%s1266_s15] sm:$0xff]  ;;  %v355_v8 = vld [vmem:[%s1266_s15 + $0x8] sm:$0xff]  ;;  %v356_v9 = vld [vmem:[%s1266_s15 + $0x10] sm:$0xff]  ;;  %p1083_p12 = pnand %p1082_p11, %p1239_p5 }
  0x1d   : > { %v977_v10 = vpack.c.bf16 %v355_v8, %v354_v7  ;;  %v357_v11 = vld [vmem:[%s1266_s15 + $0x18] sm:$0xff]  ;;  %v358_v13 = vld [vmem:[%s1266_s15 + $0x20] sm:$0xff]  ;;  %v359_v14 = vld [vmem:[%s1266_s15 + $0x28] sm:$0xff]  ;;  %708 = vperm.xlu1 %1080, %v705_v35  }
  0x1e   : > { %v983_v12 = vpack.c.bf16 %v357_v11, %v356_v9  ;;  %v989_v15 = vpack.c.bf16 %v359_v14, %v358_v13  ;;  %v360_v16 = vld [vmem:[%s1266_s15 + $0x30] sm:$0xff]  ;;  %v361_v17 = vld [vmem:[%s1266_s15 + $0x38] sm:$0xff]  ;;  %v362_v19 = vld [vmem:[%s1266_s15 + $0x40] sm:$0xff]  ;;  %p1084_p13 = pneg %p1083_p12 }
  0x1f   : > { %979 = vmatprep.subr.msk.bf16.mxu0 %vm1270_vm1, %v977_v10  ;;  %v995_v18 = vpack.c.bf16 %v361_v17, %v360_v16  ;;  %v363_v20 = vld [vmem:[%s1266_s15 + $0x48] sm:$0xff]  ;;  %v364_v22 = vld [vmem:[%s1266_s15 + $0x50] sm:$0xff]  ;;  %v365_v23 = vld [vmem:[%s1266_s15 + $0x58] sm:$0xff] }
  0x20   : > { %982 = vmatpush3.bf16.xpose.msk.msra.mxu0 %vm1270_vm1, %v977_v10  ;;  %v1001_v21 = vpack.c.bf16 %v363_v20, %v362_v19  ;;  %v1007_v24 = vpack.c.bf16 %v365_v23, %v364_v22  ;;  %v366_v25 = vld [vmem:[%s1266_s15 + $0x60] sm:$0xff]  ;;  %v367_v26 = vld [vmem:[%s1266_s15 + $0x68] sm:$0xff]  ;;  %v368_v28 = vld [vmem:[%s1266_s15 + $0x70] sm:$0xff] }
  0x21   : > { %985 = vmatprep.subr.msk.bf16.mxu0 %vm1270_vm1, %v983_v12  ;;  %v1013_v27 = vpack.c.bf16 %v367_v26, %v366_v25  ;;  %v369_v29 = vld [vmem:[%s1266_s15 + $0x78] sm:$0xff]  ;;  %s1085_s15 = sshll.u32 %s1150_s8, 4  ;;  %s1086_s15 = int_to_ptr.vmem [resolvable:$false] %s1085_s15 }
  0x22   : > { %v1019_v30 = vpack.c.bf16 %v369_v29, %v368_v28  ;;  %s1087_s17 = scalar_lea.vmem %s1086_s15, 32  ;;  %p1088_p0 = scmp.lt.s32.totalorder %s1360_s26, %s1086_s15 }
  0x23   : > { %p1089_p1 = scmp.lt.s32.totalorder %s1087_s17, %s1081_s10 }
  0x25   : > { %p1090_p2 = por %p1089_p1, %p1088_p0 }
  0x27   : > { %p1091_p3 = pnand %p1090_p2, %p1084_p13 }
  0x28   : > { %988 = vmatpush3.bf16.xpose.msk.msra.mxu0 %vm1270_vm1, %v983_v12 }
  0x29   : > { %991 = vmatprep.subr.msk.bf16.mxu0 %vm1270_vm1, %v989_v15 }
  0x30   : > { %994 = vmatpush3.bf16.xpose.msk.msra.mxu0 %vm1270_vm1, %v989_v15 }
  0x31   : > { %997 = vmatprep.subr.msk.bf16.mxu0 %vm1270_vm1, %v995_v18 }
  0x38   : > { %1000 = vmatpush3.bf16.xpose.msk.msra.mxu0 %vm1270_vm1, %v995_v18 }
  0x39   : > { %1003 = vmatprep.subr.msk.bf16.mxu0 %vm1270_vm1, %v1001_v21 }
  0x40   : > { %1006 = vmatpush3.bf16.xpose.msk.msra.mxu0 %vm1270_vm1, %v1001_v21 }
  0x41   : > { %1009 = vmatprep.subr.msk.bf16.mxu0 %vm1270_vm1, %v1007_v24 }
  0x48   : > { %1012 = vmatpush3.bf16.xpose.msk.msra.mxu0 %vm1270_vm1, %v1007_v24 }
  0x49   : > { %1015 = vmatprep.subr.msk.bf16.mxu0 %vm1270_vm1, %v1013_v27 }
  0x50   : > { %1018 = vmatpush3.bf16.xpose.msk.msra.mxu0 %vm1270_vm1, %v1013_v27 }
  0x51   : > { %1021 = vmatprep.subr.msk.bf16.mxu0 %vm1270_vm1, %v1019_v30 }
  0x58   : > { %1024 = vmatpush3.bf16.xpose.msk.msra.mxu0 %vm1270_vm1, %v1019_v30 }
  0x5f   : > { %956 = vmatmul.mubr.msk.f32.vlgmr.msra.gmra.mrb[0].mxu0 %vm384_vm0, %v371_v31 }
  0x91   : > { %v377_v36 = vpop.permute.xlu0 %376 }
  0x94   : > { %v523_v48 = vpop.permute.xlu1 %522 }
  0x95   : > { %v382_v37 = vpop.permute.xlu0 %381 }
  0x98   : > { %v528_v49 = vpop.permute.xlu1 %527 }
  0x99   : > { %v623_v58 = vpop.permute.xlu0 %622 }
  0x9c   : > { %v709_v3 = vpop.permute.xlu1 %708 }
  0x9d   : > { %v714_v4 = vrot.slane %v709_v3, %v713_v2 }
 0x132   : > { %v957_v38 = vpop.f32.mrb[0].mxu0 }
 0x133   : > { %v511_v39 = vadd.f32 %v957_v38, %v382_v37  ;;  %v505_v40 = vpop.f32.mrb[1].mxu0 }
 0x134   : > { %v506_v41 = vadd.f32 %v505_v40, %v377_v36 }
 0x135   : > { %v515_v42 = vmax.f32 %v511_v39, 0.0 }
 0x136   : > { %v514_v43 = vmax.f32 %v506_v41, 0.0 }
 0x138   : > { %v1025_v44 = vpack.c.bf16 %v515_v42, %v514_v43 }
 0x13a   : > { %1027 = vmatprep.subr.msk.bf16.mxu1 %vm1026_vm5, %v1025_v44 }
 0x13b   : > { %1030 = vmatpush3.bf16.msk.msra.mxu1 %vm1026_vm5, %v1025_v44 }
 0x13c   : > { %1031 = vmatprep.subr.bf16.mxu1 %v1147_v46 }
 0x13e   : > { %963 = vmatmul.mubr.msk.f32.vlgmr.msra.gmra.mrb[0].mxu1 %vm530_vm2, %v517_v45 }
 0x13f   : > { %969 = vmatprep.mubr.msk.f32.mxu1 %vm1148_vm6, %v1149_v47 }
 0x211   : > { %v964_v50 = vpop.f32.mrb[0].mxu1 }
 0x212   : > { %v613_v51 = vadd.f32 %v964_v50, %v528_v49  ;;  %v607_v52 = vpop.f32.mrb[1].mxu1 }
 0x213   : > { %v608_v53 = vadd.f32 %v607_v52, %v523_v48 }
 0x214   : > { %v617_v54 = vmax.f32 %v613_v51, 0.0 }
 0x215   : > { %v616_v55 = vmax.f32 %v608_v53, 0.0 }
 0x217   : > { %v1032_v56 = vpack.c.bf16 %v617_v54, %v616_v55 }
 0x219   : > { %1034 = vmatpush3.bf16.msk.msra.mxu1 %vm1033_vm8, %v1032_v56 }
 0x21a   : > { %972 = vmatprep.subr.mxu1 %v1149_v47 }
 0x21c   : > { %970 = vmatmul.mubr.msk.f32.vlgmr.msra.gmra.mrb[2].mxu1 %vm625_vm9, %v618_v57 }
 0x21d   : > { %974 = vmatprep.mubr.msk.f32.mxu1 %vm1148_vm6, %v1149_v47 }
 0x2ef   : > { %v699_v59 = vpop.f32.mrb[2].mxu1 }
 0x2f0   : > { %v700_v60 = vadd.f32 %v699_v59, %v623_v58  ;;  %v971_v61 = vpop.f32.mrb[3].mxu1 }
 0x2f2   : > { %v703_v62 = vmax.f32 %v700_v60, 0.0 }
 0x2f4   : > { %973 = vmatpush3.msk.msra.mxu1 %vm719_vm10, %v703_v62 }
 0x2f5   : > { %975 = vmatmul.mubr.msk.f32.vlgmr.msra.gmra.mrb[4].mxu1 %vm715_vm11, %v704_v63 }
 0x3c8   : > { %v789_v5 = vpop.f32.mrb[4].mxu1 }
 0x3c9   : > { %v790_v6 = vadd.f32 %v789_v5, %v714_v4  ;;  %v976_v7 = vpop.f32.mrb[5].mxu1 }
 0x3cb   : > { %793 = vst [vmem:[%s339_s25] sm:$0x1] %v790_v6 }
 0x3cc   : > { %1094 = shalt.err (!%p1091_p3)
}
 0x3cd   : > { %s1095_s22 = scalar_lea.hbm %s1358_s29, 16  ;;  %s1099_s24 = scalar_lea.hbm %s1409_s9, 32 }
 0x3ce   : > { %p1096_p4 = scmp.ne.s32.totalorder %s1358_s29, %s1095_s22  ;;  %p1100_p9 = scmp.lt.u32.totalorder %s1358_s29, %s1409_s9 }
 0x3cf   : > { %p1101_p10 = scmp.lt.u32.totalorder %s1099_s24, %s1095_s22  ;;  %p1103_p12 = scmp.lt.u32.totalorder %s1095_s22, %s1358_s29 }
 0x3d0   : > { %p1097_p7 = pnand %p1096_p4, %p1239_p5 }
 0x3d1   : > { %p1102_p11 = por %p1101_p10, %p1100_p9 }
 0x3d2   : > { %p1098_p8 = pneg %p1097_p7 }
 0x3d3   : > { %p1104_p13 = por %p1103_p12, %p1102_p11 }
 0x3d5   : > { %p1105_p0 = pnand %p1104_p13, %p1098_p8 }
 0x3d7   : > { %1108 = shalt.err (!%p1105_p0)
}
 0x3d8   : > { %1035 = dma.vmem_to_hbm [thread:$0]  (%p1239_p5), %s1360_s26, 16, %s1358_s29, %s795_s30  }
 0x3d9 PF: > { %p1041_p1 = scmp.ge.s32.totalorder %s1143_s14, 2  ;;  %s819_s28 = sand.u32 1, %s1131_s11  }
 0x3da   : > { %s820_s10 = scalar_lea.sflag [#allocation4], %s819_s28 }
 0x3db   : > { %p1038_p2 = pnand %p1041_p1, %p1243_p6 }
 0x3dd   : > { %1126 = dma.done.wait (!%p1038_p2), %s820_s10, 16  }
 0x3de   : > { %1128 = vsyncadd (!%p1038_p2), %s820_s10, 4294967280  ;;  %p21_p3 = scmp.ge.s32.totalorder %s1227_s16, 4   ;;  %s1414_s11 = smov %s1135_s12 }
 0x3df   : > { %s1415_s12 = smov %s1139_s13  ;;  %s1416_s13 = smov %s1237_s19 }
 0x3e0   : > { %s1417_s14 = smov %s1227_s16  ;;  %23 = sbr.rel (!%p21_p3) target bundleno = 6 (0x6), region = 91 }
 0x3e7   :  { %824 = vsyncpa [#allocation4], 1 }
 0x3e8   :  { %826 = vsyncpa [#allocation4 + $0x1], 1 }

</bundles_post_ra>
